<compile_context>
chip_gen: v6e
topology: v6e:2x2x1
jax: 0.10.0
libtpu: 0.0.40
codegen_flags: <defaults>
</compile_context>

<pallas_src>
import functools

import jax
import jax.numpy as jnp
from jax.experimental import pallas as pl
from jax.experimental.pallas import tpu as pltpu

_EPS = 1e-6  # F.pairwise_distance default eps (added to the difference)


def _contrastive_kernel(o1_ref, o2_ref, lbl_ref, out_ref, acc_ref, *,
                        margin, total_b, row_tile, tiles_per_part):
    p = pl.program_id(0)          # "parallel" partial-sum axis (megacore split)
    t = pl.program_id(1)          # "arbitrary" reduction axis over batch tiles

    @pl.when(t == 0)
    def _init():
        acc_ref[...] = jnp.zeros_like(acc_ref)

    o1 = o1_ref[...].astype(jnp.float32)
    o2 = o2_ref[...].astype(jnp.float32)
    diff = o1 - o2 + _EPS
    d2 = jnp.sum(diff * diff, axis=-1, keepdims=True)             # (TB, 1)
    d = jnp.sqrt(d2)                                              # only feeds the hinge
    lbl = lbl_ref[...].astype(jnp.float32)                        # (TB, 1)
    hinge = jnp.maximum(jnp.float32(margin) - d, 0.0)
    per_example = (1.0 - lbl) * d2 + lbl * (hinge * hinge)        # (TB, 1)

    # Mask rows past the true batch size (edge tile / over-allocated tiles).
    tile_idx = p * tiles_per_part + t
    row = jax.lax.broadcasted_iota(jnp.int32, per_example.shape, 0) + tile_idx * row_tile
    per_example = jnp.where(row < total_b, per_example, 0.0)

    acc_ref[...] += per_example                                   # pure VPU add per step

    @pl.when(t == pl.num_programs(1) - 1)
    def _finalize():
        part_sum = jnp.sum(acc_ref[...])                          # one reduce per part
        out_ref[...] = jnp.full((8, 128), part_sum, dtype=jnp.float32)


def _pick_row_tile(batch, feat, dtype):
    """Largest multiple-of-8 row tile keeping 2 inputs x 2 pipeline buffers under ~24 MiB."""
    itemsize = jnp.dtype(dtype).itemsize
    budget = 24 * 1024 * 1024
    per_row = 4 * feat * itemsize + 4 * 4          # o1/o2 double-buffered + f32 label
    tb = budget // max(per_row, 1)
    tb = int(max(8, min(tb, 1024)))
    tb = (tb // 8) * 8
    if tb >= batch:
        return batch                               # full-batch block is always legal
    return tb
    # TODO(synk): if feat is so large that even an 8-row tile exceeds VMEM, tile D as a
    # second "arbitrary" axis and accumulate d2 across D blocks before the sqrt/hinge.


def contrastive_loss(output1, output2, label, margin=1.0, *,
                     row_tile=None, num_partials=2):
    """output1/output2: (B, D); label: (B,) or (B, 1). Returns scalar f32 loss."""
    B, D = output1.shape
    label2d = jnp.reshape(label, (B, 1)).astype(jnp.float32)

    tb = row_tile if row_tile is not None else _pick_row_tile(B, D, output1.dtype)
    num_tiles = pl.cdiv(B, tb)
    p_parts = max(1, min(int(num_partials), num_tiles))
    tiles_per_part = pl.cdiv(num_tiles, p_parts)

    def row_map(p, t):
        # Clamp so over-allocated tiles re-read the last tile; their rows are masked out.
        return (jnp.minimum(p * tiles_per_part + t, num_tiles - 1), 0)

    kernel = functools.partial(
        _contrastive_kernel, margin=float(margin), total_b=B,
        row_tile=tb, tiles_per_part=tiles_per_part)

    itemsize = jnp.dtype(output1.dtype).itemsize
    needed = (4 * tb * D * itemsize        # o1/o2, double-buffered
              + 4 * tb * 4                 # label, double-buffered
              + 2 * 8 * 128 * 4            # output block
              + tb * 4                     # accumulator scratch
              + (2 << 20))                 # slack
    vmem_limit = int(min(60 * 1024 * 1024, max(32 * 1024 * 1024, needed)))

    out = pl.pallas_call(
        kernel,
        out_shape=jax.ShapeDtypeStruct((p_parts * 8, 128), jnp.float32),
        grid_spec=pltpu.PrefetchScalarGridSpec(
            num_scalar_prefetch=0,
            grid=(p_parts, tiles_per_part),
            in_specs=[
                pl.BlockSpec((tb, D), row_map),
                pl.BlockSpec((tb, D), row_map),
                pl.BlockSpec((tb, 1), row_map),
            ],
            out_specs=pl.BlockSpec((8, 128), lambda p, t: (p, 0)),
            scratch_shapes=[pltpu.VMEM((tb, 1), jnp.float32)],
        ),
        compiler_params=pltpu.CompilerParams(
            dimension_semantics=("parallel", "arbitrary"),
            vmem_limit_bytes=vmem_limit),
    )(output1, output2, label2d)

    partials = out[0::8, 0]                                   # (p_parts,)
    return jnp.sum(partials) / jnp.float32(B)


def _reference(output1, output2, label, margin=1.0):
    diff = output1.astype(jnp.float32) - output2.astype(jnp.float32) + _EPS
    d = jnp.sqrt(jnp.sum(diff * diff, axis=-1))
    lbl = jnp.reshape(label, (-1,)).astype(jnp.float32)
    return jnp.mean((1.0 - lbl) * d * d
                    + lbl * jnp.square(jnp.maximum(margin - d, 0.0)))


if __name__ == "__main__":
    key = jax.random.PRNGKey(0)
    k1, k2, k3, k4, k5, k6 = jax.random.split(key, 6)

    # Small Siamese embedding batch (single-tile path).
    B, D = 8, 32
    o1 = jax.random.normal(k1, (B, D), dtype=jnp.float32)
    o2 = jax.random.normal(k2, (B, D), dtype=jnp.float32)
    lbl = jax.random.bernoulli(k3, 0.5, (B,)).astype(jnp.float32)

    loss = jax.block_until_ready(contrastive_loss(o1, o2, lbl, margin=1.0))
    ref = _reference(o1, o2, lbl, margin=1.0)
    assert jnp.allclose(loss, ref, rtol=1e-5, atol=1e-5), (loss, ref)

    # Multi-tile / uneven-batch path (exercises masking + per-part partial sums).
    B2, D2 = 300, 64
    o1b = jax.random.normal(k4, (B2, D2), dtype=jnp.float32)
    o2b = jax.random.normal(k5, (B2, D2), dtype=jnp.float32)
    lblb = jax.random.bernoulli(k6, 0.5, (B2,)).astype(jnp.float32)

    loss2 = jax.block_until_ready(
        contrastive_loss(o1b, o2b, lblb, margin=1.0, row_tile=128, num_partials=2))
    ref2 = _reference(o1b, o2b, lblb, margin=1.0)
    assert jnp.allclose(loss2, ref2, rtol=1e-5, atol=1e-5), (loss2, ref2)

    print("KERNEL_OK")
</pallas_src>

<mosaic_0001>
module attributes {stable_mosaic.version = 11 : i64} {
  func.func @_contrastive_kernel(%arg0: i32, %arg1: i32, %arg2: memref<8x32xf32, #tpu.memory_space<vmem>>, %arg3: memref<8x32xf32, #tpu.memory_space<vmem>>, %arg4: memref<8x1xf32, #tpu.memory_space<vmem>>, %arg5: memref<8x128xf32, #tpu.memory_space<vmem>>, %arg6: memref<8x1xf32, #tpu.memory_space<vmem>>) attributes {dimension_semantics = [#tpu.dimension_semantics<parallel>, #tpu.dimension_semantics<arbitrary>], iteration_bounds = array<i64: 1, 1>, scalar_prefetch = 0 : i64, scratch_operands = 1 : i64, tpu.core_type = #tpu.core_type<tc>, window_params = [{transform_indices = @transform_0, window_bounds = array<i64: 8, 32>}, {transform_indices = @transform_1, window_bounds = array<i64: 8, 32>}, {transform_indices = @transform_2, window_bounds = array<i64: 8, 1>}, {transform_indices = @transform_3, window_bounds = array<i64: 8, 128>}]} {
    %c0_i32 = arith.constant 0 : i32
    %0 = arith.cmpi eq, %arg1, %c0_i32 : i32
    %1 = arith.extui %0 : i1 to i32
    %c0_i32_0 = arith.constant 0 : i32
    %2 = arith.cmpi ne, %1, %c0_i32_0 : i32
    scf.if %2 {
      %cst_18 = arith.constant 0.000000e+00 : f32
      %39 = vector.broadcast %cst_18 : f32 to vector<8x1xf32>
      %c0_19 = arith.constant 0 : index
      %c0_20 = arith.constant 0 : index
      %40 = vector.load %arg6[%c0_19, %c0_20] : memref<8x1xf32, #tpu.memory_space<vmem>>, vector<8x1xf32>
      tpu.vector_store %arg6[%c0_19, %c0_20], %39 {strides = array<i32>} : memref<8x1xf32, #tpu.memory_space<vmem>>, vector<8x1xf32>,
    } else {
    }
    %c0 = arith.constant 0 : index
    %c0_1 = arith.constant 0 : index
    %3 = vector.load %arg2[%c0, %c0_1] : memref<8x32xf32, #tpu.memory_space<vmem>>, vector<8x32xf32>
    %c0_2 = arith.constant 0 : index
    %c0_3 = arith.constant 0 : index
    %4 = vector.load %arg3[%c0_2, %c0_3] : memref<8x32xf32, #tpu.memory_space<vmem>>, vector<8x32xf32>
    %5 = arith.subf %3, %4 : vector<8x32xf32>
    %cst = arith.constant 9.99999997E-7 : f32
    %6 = vector.broadcast %cst : f32 to vector<8x32xf32>
    %7 = arith.addf %5, %6 : vector<8x32xf32>
    %8 = arith.mulf %7, %7 : vector<8x32xf32>
    %cst_4 = arith.constant dense<0.000000e+00> : vector<8xf32>
    %9 = vector.multi_reduction <add>, %8, %cst_4 [1] : vector<8x32xf32> to vector<8xf32>
    %10 = vector.shape_cast %9 : vector<8xf32> to vector<8x1xf32>
    %11 = math.sqrt %10 : vector<8x1xf32>
    %c0_5 = arith.constant 0 : index
    %c0_6 = arith.constant 0 : index
    %12 = vector.load %arg4[%c0_5, %c0_6] : memref<8x1xf32, #tpu.memory_space<vmem>>, vector<8x1xf32>
    %cst_7 = arith.constant 1.000000e+00 : f32
    %13 = vector.broadcast %cst_7 : f32 to vector<8x1xf32>
    %14 = arith.subf %13, %11 : vector<8x1xf32>
    %cst_8 = arith.constant 0.000000e+00 : f32
    %15 = vector.broadcast %cst_8 : f32 to vector<8x1xf32>
    %16 = arith.maximumf %14, %15 : vector<8x1xf32>
    %cst_9 = arith.constant 1.000000e+00 : f32
    %17 = vector.broadcast %cst_9 : f32 to vector<8x1xf32>
    %18 = arith.subf %17, %12 : vector<8x1xf32>
    %19 = arith.mulf %18, %10 : vector<8x1xf32>
    %20 = arith.mulf %16, %16 : vector<8x1xf32>
    %21 = arith.mulf %12, %20 : vector<8x1xf32>
    %22 = arith.addf %19, %21 : vector<8x1xf32>
    %c1_i32 = arith.constant 1 : i32
    %23 = arith.muli %arg0, %c1_i32 : i32
    %24 = arith.addi %23, %arg1 : i32
    %25 = tpu.iota {dimensions = array<i32: 0>} : vector<8x1xi32>
    %c8_i32 = arith.constant 8 : i32
    %26 = arith.muli %24, %c8_i32 : i32
    %27 = vector.broadcast %26 : i32 to vector<8x1xi32>
    %28 = arith.addi %25, %27 : vector<8x1xi32>
    %c8_i32_10 = arith.constant 8 : i32
    %29 = vector.broadcast %c8_i32_10 : i32 to vector<8x1xi32>
    %30 = arith.cmpi slt, %28, %29 : vector<8x1xi32>
    %cst_11 = arith.constant 0.000000e+00 : f32
    %31 = vector.broadcast %cst_11 : f32 to vector<8x1xf32>
    %32 = arith.select %30, %22, %31 : vector<8x1xi1>, vector<8x1xf32>
    %c0_12 = arith.constant 0 : index
    %c0_13 = arith.constant 0 : index
    %33 = vector.load %arg6[%c0_12, %c0_13] : memref<8x1xf32, #tpu.memory_space<vmem>>, vector<8x1xf32>
    %34 = arith.addf %33, %32 : vector<8x1xf32>
    %c0_14 = arith.constant 0 : index
    %c0_15 = arith.constant 0 : index
    %35 = vector.load %arg6[%c0_14, %c0_15] : memref<8x1xf32, #tpu.memory_space<vmem>>, vector<8x1xf32>
    tpu.vector_store %arg6[%c0_14, %c0_15], %34 {strides = array<i32>} : memref<8x1xf32, #tpu.memory_space<vmem>>, vector<8x1xf32>,
    %c0_i32_16 = arith.constant 0 : i32
    %36 = arith.cmpi eq, %arg1, %c0_i32_16 : i32
    %37 = arith.extui %36 : i1 to i32
    %c0_i32_17 = arith.constant 0 : i32
    %38 = arith.cmpi ne, %37, %c0_i32_17 : i32
    scf.if %38 {
      %c0_18 = arith.constant 0 : index
      %c0_19 = arith.constant 0 : index
      %39 = vector.load %arg6[%c0_18, %c0_19] : memref<8x1xf32, #tpu.memory_space<vmem>>, vector<8x1xf32>
      %40 = vector.shape_cast %39 : vector<8x1xf32> to vector<1x8x1xf32>
      %cst_20 = arith.constant dense<0.000000e+00> : vector<1xf32>
      %41 = vector.multi_reduction <add>, %40, %cst_20 [1, 2] : vector<1x8x1xf32> to vector<1xf32>
      %42 = vector.shape_cast %41 : vector<1xf32> to vector<1x1x1xf32>
      %43 = vector.extract %42[0, 0, 0] : f32 from vector<1x1x1xf32>
      %44 = vector.broadcast %43 : f32 to vector<8x128xf32>
      %c0_21 = arith.constant 0 : index
      %c0_22 = arith.constant 0 : index
      %45 = vector.load %arg5[%c0_21, %c0_22] : memref<8x128xf32, #tpu.memory_space<vmem>>, vector<8x128xf32>
      tpu.vector_store %arg5[%c0_21, %c0_22], %44 {strides = array<i32>} : memref<8x128xf32, #tpu.memory_space<vmem>>, vector<8x128xf32>,
    } else {
    }
    return
  }
  func.func @transform_0(%arg0: i32, %arg1: i32) -> (i32, i32) {
    %c1_i32 = arith.constant 1 : i32
    %0 = arith.muli %arg0, %c1_i32 : i32
    %1 = arith.addi %0, %arg1 : i32
    %c0_i32 = arith.constant 0 : i32
    %2 = arith.minsi %1, %c0_i32 : i32
    %c0_i32_0 = arith.constant 0 : i32
    %c0_i32_1 = arith.constant 0 : i32
    return %2, %c0_i32_0 : i32, i32
  }
  func.func @transform_1(%arg0: i32, %arg1: i32) -> (i32, i32) {
    %c1_i32 = arith.constant 1 : i32
    %0 = arith.muli %arg0, %c1_i32 : i32
    %1 = arith.addi %0, %arg1 : i32
    %c0_i32 = arith.constant 0 : i32
    %2 = arith.minsi %1, %c0_i32 : i32
    %c0_i32_0 = arith.constant 0 : i32
    %c0_i32_1 = arith.constant 0 : i32
    return %2, %c0_i32_0 : i32, i32
  }
  func.func @transform_2(%arg0: i32, %arg1: i32) -> (i32, i32) {
    %c1_i32 = arith.constant 1 : i32
    %0 = arith.muli %arg0, %c1_i32 : i32
    %1 = arith.addi %0, %arg1 : i32
    %c0_i32 = arith.constant 0 : i32
    %2 = arith.minsi %1, %c0_i32 : i32
    %c0_i32_0 = arith.constant 0 : i32
    %c0_i32_1 = arith.constant 0 : i32
    return %2, %c0_i32_0 : i32, i32
  }
  func.func @transform_3(%arg0: i32, %arg1: i32) -> (i32, i32) {
    %c0_i32 = arith.constant 0 : i32
    %c0_i32_0 = arith.constant 0 : i32
    return %arg0, %c0_i32 : i32, i32
  }
}

</mosaic_0001>

<bundles_post_ra>
// kernel: tpu_custom_call.1
= control target key start
LH: loop header
LB: loop body
LE: loop exit
PB: predicated region body
PF: predicated region fallthrough
CT: control target
= control target key end

     0   :  { %8 = vsyncpa [#allocation4], 0  ;;  %s265_s0 = inlined_call_operand.vmem [shape: f32[8,32], index: 0, kind: input, shape index: {}]   ;;  %s266_s1 = inlined_call_operand.hbm [shape: f32[8,32], index: 1, kind: input, shape index: {}]   ;;  %s267_s2 = inlined_call_operand.vmem [shape: f32[8,1], index: 2, kind: input, shape index: {}]   ;;  %s268_s3 = inlined_call_operand.hbm [shape: f32[8,128], index: 3, kind: output, shape index: {}]  }
   0x1   :  { %9 = vsyncpa [#allocation5], 0  ;;  %s227_s12 = smov [#allocation3]  }
   0x2   :  { %s33_s13 = sshll.u32 %s227_s12, 4  ;;  %s34_s13 = int_to_ptr.vmem [resolvable:$true] %s33_s13 }
   0x3   :  { %s191_s14 = scalar_lea.vmem %s34_s13, 128  ;;  %p196_p1 = scmp.lt.s32.totalorder %s34_s13, %s34_s13 }
   0x4   :  { %p192_p0 = scmp.ne.s32.totalorder %s34_s13, %s191_s14  ;;  %p197_p2 = scmp.lt.s32.totalorder %s191_s14, %s191_s14 }
   0x6   :  { %p198_p3 = por %p197_p2, %p196_p1 }
   0x8   :  { %p199_p4 = pnand %p198_p3, %p192_p0 }
   0xa   :  { %202 = shalt.err (!%p199_p4)
}
   0xb   :  { %36 = dma.hbm_to_vmem [thread:$0]  %s266_s1, 128, %s34_s13, [#allocation4]  }
   0xc   :  { %223 = dma.done.wait [#allocation4], 128  }
   0xd   :  { %224 = vsyncadd [#allocation4], 4294967168  ;;  %v95_v0 = vld [vmem:[%s265_s0] sm:$0xff]  ;;  %v96_v1 = vld [vmem:[#allocation3] sm:$0xff]  ;;  %vm100_vm0 = vcmask 261120   ;;  %vm93_vm1 = vcmask 7168  }
   0xe   :  { %v97_v2 = vsub.f32 %v95_v0, %v96_v1  ;;  %v228_v6 = vmov 0.0   ;;  %v111_v12 = vld [vmem:[%s267_s2] sm:$0xff]  ;;  %s229_s2 = smov [#allocation6]  }
   0xf   :  { %94 = vst.msk [vmem:[#allocation2] sm:$0xff] %vm93_vm1, %v228_v6  ;;  %v114_v15 = vsub.f32 1.0, %v111_v12  ;;  %s153_s19 = sshll.u32 %s229_s2, 4  ;;  %s154_s19 = int_to_ptr.vmem [resolvable:$true] %s153_s19 }
  0x10   :  { %v98_v3 = vadd.f32 1e-06, %v97_v2  ;;  %s203_s21 = scalar_lea.vmem %s154_s19, 128  ;;  %p208_p6 = scmp.lt.s32.totalorder %s154_s19, %s154_s19 }
  0x11   :  { %p204_p5 = scmp.ne.s32.totalorder %s154_s19, %s203_s21  ;;  %p209_p7 = scmp.lt.s32.totalorder %s203_s21, %s203_s21 }
  0x12   :  { %v99_v4 = vmul.f32 %v98_v3, %v98_v3 }
  0x13   :  { %p210_p8 = por %p209_p7, %p208_p6 }
  0x14   :  { %v101_v5 = vsel %vm100_vm0, %v99_v4, 0.0 }
  0x15   :  { %102 = vadd.xlane.f32.xlu0 %v101_v5  ;;  %p211_p9 = pnand %p210_p8, %p204_p5 }
  0x16   :  { %v127_v20 = vld [vmem:[#allocation2] sm:$0xff] }
  0x9e   :  { %v103_v7 = vpop.xlane.xlu0 %102 }
  0x9f   :  { %181 = vrsqrt.f32 %v103_v7  ;;  %vm106_vm2 = vcmp.eq.f32.partialorder %v103_v7, inf  ;;  %v109_v10 = vand.u32 2147483648, %v103_v7  ;;  %vm108_vm3 = vcmp.eq.f32.partialorder %v103_v7, 0.0 }
  0xa0   :  { %v115_v18 = vmul.f32 %v114_v15, %v103_v7 }
  0xac   :  { %v182_v8 = vpop.eup %181 }
  0xad   :  { %v105_v9 = vmul.f32 %v182_v8, %v103_v7 }
  0xaf   :  { %v107_v11 = vsel %vm106_vm2, %v103_v7, %v105_v9 }
  0xb0   :  { %v110_v13 = vsel %vm108_vm3, %v109_v10, %v107_v11 }
  0xb1   :  { %v112_v14 = vsub.f32 1.0, %v110_v13 }
  0xb3   :  { %v113_v16 = vmax.f32 %v112_v14, 0.0 }
  0xb5   :  { %v116_v17 = vmul.f32 %v113_v16, %v113_v16 }
  0xb7   :  { %v117_v19 = vmul.f32 %v116_v17, %v111_v12 }
  0xb9   :  { %v118_v21 = vadd.f32 %v117_v19, %v115_v18 }
  0xbb   :  { %v128_v22 = vadd.f32 %v127_v20, %v118_v21 }
  0xbd   :  { %130 = vst.msk [vmem:[#allocation2] sm:$0xff] %vm93_vm1, %v128_v22 }
  0xc4   :  { %v134_v23 = vld [vmem:[#allocation2] sm:$0xff] }
  0xc5   :  { %v135_v24 = vsel %vm93_vm1, %v134_v23, 0.0 }
  0xc6   :  { %136 = vadd.xlane.f32.xlu0 %v135_v24 }
 0x14f   :  { %v137_v25 = vpop.xlane.xlu0 %136 }
 0x150   :  { %v138_v26 = vrot.slane %v137_v25, 4 }
 0x152   :  { %v139_v27 = vadd.f32 %v138_v26, %v137_v25 }
 0x154   :  { %v140_v28 = vrot.slane %v139_v27, 2 }
 0x156   :  { %v141_v29 = vadd.f32 %v140_v28, %v139_v27 }
 0x158   :  { %v142_v30 = vrot.slane %v141_v29, 1 }
 0x15a   :  { %v143_v31 = vadd.f32 %v142_v30, %v141_v29 }
 0x15c   :  { %176 = vpush %v143_v31 }
 0x18d   :  { %s177_s20 = spop %176 }
 0x18e   :  { %v145_v32 = vstv %s177_s20 }
 0x18f   :  { %146 = vst [vmem:[#allocation6] sm:$0xff] %v145_v32 }
 0x190   :  { %214 = shalt.err (!%p211_p9)
}
 0x191   :  { %156 = dma.vmem_to_hbm [thread:$0]  %s154_s19, 128, %s268_s3, [#allocation5]  }
 0x192   :  { %225 = dma.done.wait [#allocation5], 128  }
 0x193   :  { %226 = vsyncadd [#allocation5], 4294967168 }
 0x194   :  { %160 = vsyncpa [#allocation4], 1 }
 0x195   :  { %161 = vsyncpa [#allocation5], 1 }

</bundles_post_ra>
